<compile_context>
chip_gen: v7x
topology: tpu7x:2x2x1
jax: 0.10.0
libtpu: 0.0.40
codegen_flags: <defaults>
</compile_context>

<pallas_src>
import jax
import jax.numpy as jnp
from jax import lax
from jax.experimental import pallas as pl
from jax.experimental.pallas import tpu as pltpu


def linear_kernel(x_ref, w_ref, b_ref, o_ref):
    """out[tb, N] = x[tb, K] @ w[N, K]^T + b[1, N]   (single MXU call, f32 accumulate)."""
    out = lax.dot_general(
        x_ref[...],               # [tb, K]
        w_ref[...],               # [N, K]  -- contract both on their last axis
        dimension_numbers=(((1,), (1,)), ((), ())),
        preferred_element_type=jnp.float32,
    )
    o_ref[...] = (out + b_ref[...]).astype(o_ref.dtype)


def linear_classifier_forward(features, weight, bias):
    """features: [B, feat_dim]; weight: [num_classes, feat_dim]; bias: [num_classes]."""
    B, K = features.shape
    N, Kw = weight.shape
    assert K == Kw, "feature dim mismatch"

    b2d = bias.reshape(1, N)  # keep bias 2-D for TPU layout

    # Batch tiling: single step for small B; split across batch (parallel -> can
    # use both v7x TensorCores) only when the batch is large. K is never tiled.
    if B >= 512 and B % 256 == 0:
        tb = 256
    else:
        tb = B
    grid = (B // tb,)

    return pl.pallas_call(
        linear_kernel,
        out_shape=jax.ShapeDtypeStruct((B, N), features.dtype),
        grid_spec=pltpu.PrefetchScalarGridSpec(
            num_scalar_prefetch=0,
            grid=grid,
            in_specs=[
                pl.BlockSpec((tb, K), lambda i: (i, 0)),   # x batch tile, full K
                pl.BlockSpec((N, K), lambda i: (0, 0)),    # weight, native [N, K], resident
                pl.BlockSpec((1, N), lambda i: (0, 0)),    # bias, resident
            ],
            out_specs=pl.BlockSpec((tb, N), lambda i: (i, 0)),
        ),
        compiler_params=pltpu.CompilerParams(
            dimension_semantics=("parallel",),   # batch axis is independent
        ),
    )(features, weight, b2d)


if __name__ == "__main__":
    # LinearClassifier(name='resnet50', num_classes=10) -> fc: 2048 -> 10
    FEAT_DIM = 2048
    NUM_CLASSES = 10
    BATCH = 8

    key = jax.random.PRNGKey(0)
    kx, kw, kb = jax.random.split(key, 3)

    features = jax.random.normal(kx, (BATCH, FEAT_DIM), dtype=jnp.float32)

    # Deterministic init mimicking nn.Linear defaults (uniform in +/- 1/sqrt(fan_in)).
    bound = 1.0 / (FEAT_DIM ** 0.5)
    weight = jax.random.uniform(
        kw, (NUM_CLASSES, FEAT_DIM), minval=-bound, maxval=bound, dtype=jnp.float32
    )
    bias = jax.random.uniform(
        kb, (NUM_CLASSES,), minval=-bound, maxval=bound, dtype=jnp.float32
    )

    out = linear_classifier_forward(features, weight, bias)
    out = jax.block_until_ready(out)

    # Reference check against plain JAX.
    ref = features @ weight.T + bias
    assert out.shape == (BATCH, NUM_CLASSES)
    assert jnp.allclose(out, ref, atol=1e-4, rtol=1e-4)

    print("KERNEL_OK")
</pallas_src>

<mosaic_0001>
module attributes {stable_mosaic.version = 11 : i64} {
  func.func @linear_kernel(%arg0: i32, %arg1: memref<8x2048xf32, #tpu.memory_space<vmem>>, %arg2: memref<10x2048xf32, #tpu.memory_space<vmem>>, %arg3: memref<1x10xf32, #tpu.memory_space<vmem>>, %arg4: memref<8x10xf32, #tpu.memory_space<vmem>>) attributes {dimension_semantics = [#tpu.dimension_semantics<parallel>], iteration_bounds = array<i64: 1>, scalar_prefetch = 0 : i64, scratch_operands = 0 : i64, tpu.core_type = #tpu.core_type<tc>, window_params = [{transform_indices = @transform_0, window_bounds = array<i64: 8, 2048>}, {pipeline_mode = #tpu.pipeline_mode<synchronous>, transform_indices = @transform_1, window_bounds = array<i64: 10, 2048>}, {pipeline_mode = #tpu.pipeline_mode<synchronous>, transform_indices = @transform_2, window_bounds = array<i64: 1, 10>}, {transform_indices = @transform_3, window_bounds = array<i64: 8, 10>}]} {
    %c0 = arith.constant 0 : index
    %c0_0 = arith.constant 0 : index
    %0 = vector.load %arg1[%c0, %c0_0] : memref<8x2048xf32, #tpu.memory_space<vmem>>, vector<8x2048xf32>
    %c0_1 = arith.constant 0 : index
    %c0_2 = arith.constant 0 : index
    %1 = vector.load %arg2[%c0_1, %c0_2] : memref<10x2048xf32, #tpu.memory_space<vmem>>, vector<10x2048xf32>
    %cst = arith.constant dense<0.000000e+00> : vector<8x10xf32>
    %2 = tpu.matmul %0, %1, %cst {dimension_numbers = #tpu.dot_dimension_numbers<[1], [1], [0], [0], [0, 0, 1, 0], [], []>} : vector<8x2048xf32>, vector<10x2048xf32>, vector<8x10xf32> -> vector<8x10xf32>
    %c0_3 = arith.constant 0 : index
    %c0_4 = arith.constant 0 : index
    %3 = vector.load %arg3[%c0_3, %c0_4] : memref<1x10xf32, #tpu.memory_space<vmem>>, vector<1x10xf32>
    %4 = vector.broadcast %3 : vector<1x10xf32> to vector<8x10xf32>
    %5 = arith.addf %2, %4 : vector<8x10xf32>
    %c0_5 = arith.constant 0 : index
    %c0_6 = arith.constant 0 : index
    %6 = vector.load %arg4[%c0_5, %c0_6] : memref<8x10xf32, #tpu.memory_space<vmem>>, vector<8x10xf32>
    tpu.vector_store %arg4[%c0_5, %c0_6], %5 {strides = array<i32>} : memref<8x10xf32, #tpu.memory_space<vmem>>, vector<8x10xf32>,
    return
  }
  func.func @transform_0(%arg0: i32) -> (i32, i32) {
    %c0_i32 = arith.constant 0 : i32
    %c0_i32_0 = arith.constant 0 : i32
    return %arg0, %c0_i32 : i32, i32
  }
  func.func @transform_1(%arg0: i32) -> (i32, i32) {
    %c0_i32 = arith.constant 0 : i32
    %c0_i32_0 = arith.constant 0 : i32
    %c0_i32_1 = arith.constant 0 : i32
    return %c0_i32, %c0_i32_0 : i32, i32
  }
  func.func @transform_2(%arg0: i32) -> (i32, i32) {
    %c0_i32 = arith.constant 0 : i32
    %c0_i32_0 = arith.constant 0 : i32
    %c0_i32_1 = arith.constant 0 : i32
    return %c0_i32, %c0_i32_0 : i32, i32
  }
  func.func @transform_3(%arg0: i32) -> (i32, i32) {
    %c0_i32 = arith.constant 0 : i32
    %c0_i32_0 = arith.constant 0 : i32
    return %arg0, %c0_i32 : i32, i32
  }
}

</mosaic_0001>

<bundles_post_ra>
// kernel: tpu_custom_call.1
= control target key start
LH: loop header
LB: loop body
LE: loop exit
PB: predicated region body
PF: predicated region fallthrough
CT: control target
= control target key end

     0   :  { %8 = vsyncpa [#allocation3], 0  ;;  %s869_s0 = inlined_call_operand.hbm [shape: f32[8,2048], index: 0, kind: input, shape index: {}]   ;;  %s870_s1 = inlined_call_operand.hbm [shape: f32[10,2048], index: 1, kind: input, shape index: {}]   ;;  %s871_s2 = inlined_call_operand.vmem [shape: f32[1,10], index: 2, kind: input, shape index: {}]   ;;  %s872_s3 = inlined_call_operand.hbm [shape: f32[8,10], index: 3, kind: output, shape index: {}]  }
   0x1   :  { %9 = vsyncpa [#allocation6], 0 }
   0x2   :  { %10 = vsyncpa [#allocation4], 0  ;;  %s798_s12 = smov [#allocation2]   ;;  %s799_s14 = smov [#allocation5]  }
   0x3   :  { %s17_s13 = sshll.u32 %s798_s12, 4  ;;  %s26_s15 = sshll.u32 %s799_s14, 4  ;;  %s18_s13 = int_to_ptr.vmem [resolvable:$true] %s17_s13  ;;  %s823_s15 = int_to_ptr.vmem [resolvable:$true] %s26_s15 }
   0x4   :  { %s726_s18 = scalar_lea.hbm %s869_s0, 2048 }
   0x5   :  { %p727_p0 = scmp.ne.s32.totalorder %s869_s0, %s726_s18  ;;  %p730_p1 = scmp.lt.u32.totalorder %s726_s18, %s869_s0 }
   0x7   :  { %p732_p2 = pnand %p730_p1, %p727_p0 }
   0x9   :  { %735 = shalt.err (!%p732_p2)
}
   0xa   :  { %s736_s23 = scalar_lea.vmem %s18_s13, 2048  ;;  %p741_p4 = scmp.lt.s32.totalorder %s18_s13, %s18_s13 }
   0xb   :  { %p737_p3 = scmp.ne.s32.totalorder %s18_s13, %s736_s23  ;;  %p742_p5 = scmp.lt.s32.totalorder %s736_s23, %s736_s23 }
   0xd   :  { %p743_p6 = por %p742_p5, %p741_p4 }
   0xf   :  { %p744_p7 = pnand %p743_p6, %p737_p3 }
  0x11   :  { %747 = shalt.err (!%p744_p7)
}
  0x12   :  { %20 = dma.hbm_to_vmem [thread:$0]  %s869_s0, 2048, %s18_s13, [#allocation3]  }
  0x13   :  { %s748_s28 = scalar_lea.hbm %s870_s1, 4096 }
  0x14   :  { %p749_p8 = scmp.ne.s32.totalorder %s870_s1, %s748_s28  ;;  %p752_p9 = scmp.lt.u32.totalorder %s748_s28, %s870_s1 }
  0x16   :  { %p754_p10 = pnand %p752_p9, %p749_p8 }
  0x18   :  { %757 = shalt.err (!%p754_p10)
}
  0x19   :  { %s758_s6 = scalar_lea.vmem %s823_s15, 4096  ;;  %p763_p12 = scmp.lt.s32.totalorder %s823_s15, %s823_s15 }
  0x1a   :  { %p759_p11 = scmp.ne.s32.totalorder %s823_s15, %s758_s6  ;;  %p764_p13 = scmp.lt.s32.totalorder %s758_s6, %s758_s6 }
  0x1c   :  { %p765_p0 = por %p764_p13, %p763_p12 }
  0x1e   :  { %p766_p1 = pnand %p765_p0, %p759_p11 }
  0x20   :  { %769 = shalt.err (!%p766_p1)
}
  0x21   :  { %s800_s0 = smov 2048   ;;  %s801_s7 = smov 128  }
  0x22   :  { %32 = dma.hbm_to_vmem [thread:$0]  %s870_s1, 4096, %s823_s15, [#allocation6], %s800_s0, %s800_s0, %s801_s7  }
  0x23   :  { %792 = dma.done.wait [#allocation3], 2048  }
  0x24   :  { %793 = vsyncadd [#allocation3], 4294965248 }
  0x25   :  { %794 = dma.done.wait [#allocation6], 4096  }
  0x26   :  { %795 = vsyncadd [#allocation6], 4294963200  ;;  %v58_v0 = vld [vmem:[#allocation5 + $0x8] sm:$0xff]  ;;  %v57_v5 = vld [vmem:[#allocation5] sm:$0xff]  ;;  %s802_s11 = smov [#allocation7]   ;;  %vm656_vm0 = vcmask 80896  }
  0x27   :  { %v74_v1 = vld [vmem:[#allocation5 + $0x88] sm:$0x3]  ;;  %v73_v6 = vld [vmem:[#allocation5 + $0x80] sm:$0x3]  ;;  %v60_v14 = vld [vmem:[#allocation5 + $0x18] sm:$0xff]  ;;  %s664_s12 = sshll.u32 %s802_s11, 4  ;;  %s665_s12 = int_to_ptr.vmem [resolvable:$true] %s664_s12 }
  0x28   :  { %v66_v2 = vld [vmem:[#allocation5 + $0x48] sm:$0xff]  ;;  %v675_v3 = vpack.c.bf16 %v74_v1, %v58_v0  ;;  %v677_v8 = vpack.c.bf16 %v73_v6, %v57_v5  ;;  %v65_v9 = vld [vmem:[#allocation5 + $0x40] sm:$0xff]  ;;  %v76_v15 = vld [vmem:[#allocation5 + $0x98] sm:$0x3]  ;;  %s770_s13 = scalar_lea.vmem %s665_s12, 128  ;;  %p775_p3 = scmp.lt.s32.totalorder %s665_s12, %s665_s12 }
  0x29   :  { %v82_v4 = vld [vmem:[#allocation5 + $0xc8] sm:$0x3]  ;;  %v81_v10 = vld [vmem:[#allocation5 + $0xc0] sm:$0x3]  ;;  %v68_v16 = vld [vmem:[#allocation5 + $0x58] sm:$0xff]  ;;  %v679_v17 = vpack.c.bf16 %v76_v15, %v60_v14  ;;  %p771_p2 = scmp.ne.s32.totalorder %s665_s12, %s770_s13  ;;  %p776_p4 = scmp.lt.s32.totalorder %s770_s13, %s770_s13 }
  0x2a   :  { %v691_v7 = vpack.c.bf16 %v82_v4, %v66_v2  ;;  %v42_v11 = vld [vmem:[#allocation2 + $0x8] sm:$0xff]  ;;  %676 = vmatprep.subr.bf16.mxu1 %v675_v3  ;;  %v693_v12 = vpack.c.bf16 %v81_v10, %v65_v9  ;;  %v84_v18 = vld [vmem:[#allocation5 + $0xd8] sm:$0x3]  ;;  %v59_v19 = vld [vmem:[#allocation5 + $0x10] sm:$0xff] }
  0x2b   :  { %160 = vmatprep.mubr.f32.mxu1 %v42_v11  ;;  %v50_v13 = vld [vmem:[#allocation2 + $0x48] sm:$0xff]  ;;  %678 = vmatpush1.bf16.xpose.msra.mxu1 %v677_v8  ;;  %v75_v20 = vld [vmem:[#allocation5 + $0x90] sm:$0x3]  ;;  %v695_v21 = vpack.c.bf16 %v84_v18, %v68_v16  ;;  %v41_v25 = vld [vmem:[#allocation2] sm:$0xff]  ;;  %p777_p5 = por %p776_p4, %p775_p3 }
  0x2c   :  { %692 = vmatprep.subr.bf16.mxu0 %v691_v7  ;;  %440 = vmatprep.mubr.f32.mxu0 %v50_v13  ;;  %v67_v22 = vld [vmem:[#allocation5 + $0x50] sm:$0xff]  ;;  %v62_v24 = vld [vmem:[#allocation5 + $0x28] sm:$0xff]  ;;  %v681_v26 = vpack.c.bf16 %v75_v20, %v59_v19  ;;  %v49_v29 = vld [vmem:[#allocation2 + $0x40] sm:$0xff] }
  0x2d   :  { %694 = vmatpush1.bf16.xpose.msra.mxu0 %v693_v12  ;;  %v83_v23 = vld [vmem:[#allocation5 + $0xd0] sm:$0x3]  ;;  %680 = vmatprep.subr.bf16.mxu1 %v679_v17  ;;  %v78_v27 = vld [vmem:[#allocation5 + $0xa8] sm:$0x3]  ;;  %v44_v32 = vld [vmem:[#allocation2 + $0x18] sm:$0xff]  ;;  %p778_p6 = pnand %p777_p5, %p771_p2 }
  0x2e   :  { %696 = vmatprep.subr.bf16.mxu0 %v695_v21  ;;  %v70_v28 = vld [vmem:[#allocation5 + $0x68] sm:$0xff]  ;;  %v697_v30 = vpack.c.bf16 %v83_v23, %v67_v22  ;;  %v683_v33 = vpack.c.bf16 %v78_v27, %v62_v24  ;;  %v52_v34 = vld [vmem:[#allocation2 + $0x58] sm:$0xff]  ;;  %v61_v36 = vld [vmem:[#allocation5 + $0x20] sm:$0xff] }
  0x2f   :  { %v86_v31 = vld [vmem:[#allocation5 + $0xe8] sm:$0x3]  ;;  %v77_v37 = vld [vmem:[#allocation5 + $0xa0] sm:$0x3]  ;;  %v64_v40 = vld [vmem:[#allocation5 + $0x38] sm:$0xff] }
  0x30   :  { %v699_v35 = vpack.c.bf16 %v86_v31, %v70_v28  ;;  %v69_v38 = vld [vmem:[#allocation5 + $0x60] sm:$0xff]  ;;  %v80_v41 = vld [vmem:[#allocation5 + $0xb8] sm:$0x3]  ;;  %v43_v42 = vld [vmem:[#allocation2 + $0x10] sm:$0xff]  ;;  %v685_v43 = vpack.c.bf16 %v77_v37, %v61_v36 }
  0x31   :  { %v85_v39 = vld [vmem:[#allocation5 + $0xe0] sm:$0x3]  ;;  %v72_v44 = vld [vmem:[#allocation5 + $0x78] sm:$0xff]  ;;  %v51_v46 = vld [vmem:[#allocation2 + $0x50] sm:$0xff]  ;;  %v687_v49 = vpack.c.bf16 %v80_v41, %v64_v40 }
  0x32   :  { %161 = vmatmul.mubr.f32.vlgmr.msra.gmra.mrb[0].mxu1 %v41_v25  ;;  %v88_v45 = vld [vmem:[#allocation5 + $0xf8] sm:$0x3]  ;;  %v701_v47 = vpack.c.bf16 %v85_v39, %v69_v38  ;;  %v46_v48 = vld [vmem:[#allocation2 + $0x28] sm:$0xff]  ;;  %v63_v52 = vld [vmem:[#allocation5 + $0x30] sm:$0xff] }
  0x33   :  { %682 = vmatpush1.bf16.xpose.msra.mxu1 %v681_v26  ;;  %230 = vmatprep.mubr.f32.mxu1 %v44_v32  ;;  %v54_v50 = vld [vmem:[#allocation2 + $0x68] sm:$0xff]  ;;  %v703_v51 = vpack.c.bf16 %v88_v45, %v72_v44  ;;  %v79_v53 = vld [vmem:[#allocation5 + $0xb0] sm:$0x3]  ;;  %v45_v56 = vld [vmem:[#allocation2 + $0x20] sm:$0xff] }
  0x34   :  { %441 = vmatmul.mubr.f32.vlgmr.msra.gmra.mrb[0].mxu0 %v49_v29  ;;  %684 = vmatprep.subr.bf16.mxu1 %v683_v33  ;;  %v71_v54 = vld [vmem:[#allocation5 + $0x70] sm:$0xff]  ;;  %v689_v57 = vpack.c.bf16 %v79_v53, %v63_v52  ;;  %v53_v58 = vld [vmem:[#allocation2 + $0x60] sm:$0xff]  ;;  %v48_v60 = vld [vmem:[#allocation2 + $0x38] sm:$0xff] }
  0x35   :  { %698 = vmatpush1.bf16.xpose.msra.mxu0 %v697_v30  ;;  %510 = vmatprep.mubr.f32.mxu0 %v52_v34  ;;  %v87_v55 = vld [vmem:[#allocation5 + $0xf0] sm:$0x3]  ;;  %v56_v61 = vld [vmem:[#allocation2 + $0x78] sm:$0xff]  ;;  %v674_v0 = vld [vmem:[%s871_s2] ss:$0 sm:$0xff] }
  0x36   :  { %700 = vmatprep.subr.bf16.mxu0 %v699_v35  ;;  %v705_v59 = vpack.c.bf16 %v87_v55, %v71_v54  ;;  %v47_v62 = vld [vmem:[#allocation2 + $0x30] sm:$0xff] }
  0x37   :  { %v55_v63 = vld [vmem:[#allocation2 + $0x70] sm:$0xff] }
  0x3a   :  { %231 = vmatmul.mubr.f32.vlgmr.msra.gmra.mrb[0].mxu1 %v43_v42 }
  0x3b   :  { %686 = vmatpush1.bf16.xpose.msra.mxu1 %v685_v43  ;;  %300 = vmatprep.mubr.f32.mxu1 %v46_v48 }
  0x3c   :  { %511 = vmatmul.mubr.f32.vlgmr.msra.gmra.mrb[0].mxu0 %v51_v46  ;;  %688 = vmatprep.subr.bf16.mxu1 %v687_v49 }
  0x3d   :  { %702 = vmatpush1.bf16.xpose.msra.mxu0 %v701_v47  ;;  %580 = vmatprep.mubr.f32.mxu0 %v54_v50 }
  0x3e   :  { %704 = vmatprep.subr.bf16.mxu0 %v703_v51 }
  0x42   :  { %301 = vmatmul.mubr.f32.vlgmr.msra.gmra.mrb[0].mxu1 %v45_v56 }
  0x43   :  { %690 = vmatpush1.bf16.xpose.msra.mxu1 %v689_v57  ;;  %370 = vmatprep.mubr.f32.mxu1 %v48_v60 }
  0x44   :  { %581 = vmatmul.mubr.f32.vlgmr.msra.gmra.mrb[0].mxu0 %v53_v58 }
  0x45   :  { %706 = vmatpush1.bf16.xpose.msra.mxu0 %v705_v59  ;;  %650 = vmatprep.mubr.f32.mxu0 %v56_v61 }
  0x4a   :  { %371 = vmatmul.mubr.f32.vlgmr.msra.gmra.mrb[0].mxu1 %v47_v62 }
  0x4c   :  { %651 = vmatmul.mubr.f32.vlgmr.msra.gmra.mrb[0].mxu0 %v55_v63 }
 0x11d   :  { %v372_v1 = vpop.f32.mrb[0].mxu1 }
 0x11e   :  { %v707_v2 = vadd.f32 %v674_v0, %v372_v1  ;;  %v374_v4 = vpop.f32.mrb[1].mxu1 }
 0x11f   :  { %v652_v3 = vpop.f32.mrb[0].mxu0 }
 0x120   :  { %v654_v5 = vpop.f32.mrb[1].mxu0  ;;  %v708_v6 = vadd.f32 %v707_v2, %v652_v3 }
 0x122   :  { %657 = vst.msk [vmem:[#allocation7] sm:$0xff] %vm656_vm0, %v708_v6 }
 0x123   :  { %781 = shalt.err (!%p778_p6)
}
 0x124   :  { %s782_s15 = scalar_lea.hbm %s872_s3, 128 }
 0x125   :  { %p783_p7 = scmp.ne.s32.totalorder %s872_s3, %s782_s15  ;;  %p786_p8 = scmp.lt.u32.totalorder %s782_s15, %s872_s3 }
 0x127   :  { %p788_p9 = pnand %p786_p8, %p783_p7 }
 0x129   :  { %791 = shalt.err (!%p788_p9)
}
 0x12a   :  { %667 = dma.vmem_to_hbm [thread:$0]  %s665_s12, 128, %s872_s3, [#allocation4]  }
 0x12b   :  { %796 = dma.done.wait [#allocation4], 128  }
 0x12c   :  { %797 = vsyncadd [#allocation4], 4294967168 }
 0x12d   :  { %671 = vsyncpa [#allocation3], 1 }
 0x12e   :  { %672 = vsyncpa [#allocation6], 1 }
 0x12f   :  { %673 = vsyncpa [#allocation4], 1 }

</bundles_post_ra>
